<compile_context>
chip_gen: v7x
topology: tpu7x:2x2x1
jax: 0.10.0
libtpu: 0.0.40
codegen_flags: <defaults>
</compile_context>

<pallas_src>
import functools

import jax
import jax.numpy as jnp
import numpy as np
from jax.experimental import pallas as pl
from jax.experimental.pallas import tpu as pltpu

NEG = -1.0e30  # finite stand-in for -inf (avoids inf-inf NaNs); pairs with zero_infinity

_ROLL_NUMPY_LIKE = None


def _probe_roll_convention():
    """One-time defensive check of pltpu.roll's rotation direction (np.roll-like?)."""
    global _ROLL_NUMPY_LIKE
    if _ROLL_NUMPY_LIKE is None:
        def probe_kernel(x_ref, o_ref):
            o_ref[...] = pltpu.roll(x_ref[...], shift=1, axis=1)

        x = jnp.arange(128, dtype=jnp.float32).reshape(1, 128)
        y = pl.pallas_call(
            probe_kernel,
            out_shape=jax.ShapeDtypeStruct((1, 128), jnp.float32),
        )(x)
        _ROLL_NUMPY_LIKE = bool(np.asarray(y)[0, 0] == 127.0)
    return _ROLL_NUMPY_LIKE


def _ctc_kernel(hlens_ref, yslens_ref,                        # scalar prefetch (SMEM)
                hs_ref, w_ref, bias_ref, ext_ref, skip_ref,   # inputs
                loss_ref,                                     # output
                alpha_ref, lp_ref, wg_ref, bg_ref,            # VMEM scratch
                *, shift1, shift2):
    # hs_ref: (1, Tt, D) | w_ref: (D, V) | bias_ref: (1, V) f32
    # ext_ref/skip_ref: (B, SW) int32 | loss_ref: (1, 8, 128) f32
    # alpha_ref: (1, SW) f32 (carried across time tiles) | lp_ref: (Tt, SW) f32
    # wg_ref: (D, SW) | bg_ref: (1, SW) f32
    bi = pl.program_id(0)          # sequence index
    tt = pl.program_id(1)          # time-tile index
    n_tt = pl.num_programs(1)

    _, Tt, _D = hs_ref.shape
    V = w_ref.shape[1]
    SW = lp_ref.shape[1]

    t_b = hlens_ref[bi]            # valid input length of this sequence
    l_b = yslens_ref[bi]           # valid label length
    s_b = 2 * l_b + 1              # extended (blank-interleaved) label length
    t0 = tt * Tt                   # first global timestep of this tile

    s_idx = jax.lax.broadcasted_iota(jnp.int32, (1, SW), 1)
    allow_skip = skip_ref[pl.ds(bi, 1), :] != 0          # (1, SW), precomputed on host

    # --- once per sequence: gather the projection columns of the extended labels ---
    @pl.when(tt == 0)
    def _gather_columns():
        ext_row = ext_ref[pl.ds(bi, 1), :]                        # (1, SW) int32
        v_idx = jax.lax.broadcasted_iota(jnp.int32, (V, SW), 0)
        onehot = v_idx == ext_row                                 # exact 0/1 selection
        wg = jnp.dot(w_ref[...], onehot.astype(w_ref.dtype),
                     preferred_element_type=jnp.float32)
        wg_ref[...] = wg.astype(wg_ref.dtype)                     # exact column gather
        bg_ref[...] = jnp.dot(bias_ref[...], onehot.astype(jnp.float32),
                              preferred_element_type=jnp.float32)

    # --- per tile: projection (MXU) + online lse + label-column matmul gather ---
    @pl.when((tt == 0) | (t0 < t_b))        # skip tiles entirely past the sequence
    def _project():
        # TODO(synk): F.dropout with p=0.0 is the identity; no RNG path emitted.
        x = hs_ref[0]                                             # (Tt, D)
        logits = jnp.dot(x, w_ref[...],
                         preferred_element_type=jnp.float32) + bias_ref[...]
        mx = jnp.max(logits, axis=-1, keepdims=True)
        lse = mx + jnp.log(jnp.sum(jnp.exp(logits - mx), axis=-1, keepdims=True))
        lp_ref[...] = (jnp.dot(x, wg_ref[...], preferred_element_type=jnp.float32)
                       + bg_ref[...] - lse)        # log p(extended label s) per local t

    # --- alpha init at global t == 0 ---
    @pl.when(tt == 0)
    def _init():
        lp0 = lp_ref[pl.ds(0, 1), :]
        a0 = jnp.where(s_idx == 0, lp0, NEG)
        a0 = jnp.where((s_idx == 1) & (l_b > 0), lp0, a0)
        alpha_ref[...] = a0

    # --- CTC alpha recursion over the valid timesteps of this tile (XLU rolls) ---
    start = jnp.where(tt == 0, 1, 0)
    stop = jnp.clip(t_b - t0, 0, Tt)         # number of valid local timesteps

    def step(i, alpha):
        a1 = jnp.where(s_idx >= 1, pltpu.roll(alpha, shift=shift1, axis=1), NEG)
        a2 = jnp.where(allow_skip, pltpu.roll(alpha, shift=shift2, axis=1), NEG)
        m = jnp.maximum(alpha, jnp.maximum(a1, a2))
        tot = jnp.exp(alpha - m) + jnp.exp(a1 - m) + jnp.exp(a2 - m)
        return m + jnp.log(tot) + lp_ref[pl.ds(i, 1), :]

    alpha_ref[...] = jax.lax.fori_loop(start, stop, step, alpha_ref[...])

    # --- readout at the last tile: loss_b = -logaddexp(alpha[S-1], alpha[S-2]) ---
    @pl.when(tt == n_tt - 1)
    def _readout():
        a = alpha_ref[...]
        a_end = jnp.sum(jnp.where(s_idx == s_b - 1, a, 0.0))
        a_end2 = jnp.sum(jnp.where(s_idx == s_b - 2, a, 0.0))
        a_end2 = jnp.where(s_b >= 2, a_end2, NEG)
        m = jnp.maximum(a_end, a_end2)
        ll = m + jnp.log(jnp.exp(a_end - m) + jnp.exp(a_end2 - m))
        per = -ll
        per = jnp.where(per > -0.5 * NEG, 0.0, per)               # zero_infinity=True
        loss_ref[...] = jnp.full(loss_ref.shape, per, dtype=jnp.float32)


def ctc_forward(hs_pad, hlens, ys_pad, ys_lens, w, bias, *,
                sw=128, t_tile=256, matmul_dtype=jnp.bfloat16):
    """Forward of wenet CTC (dropout=0.0, reduce=True). Returns (loss, None)."""
    B, T, D = hs_pad.shape
    V = w.shape[1]
    Lmax = ys_pad.shape[1]
    assert sw % 128 == 0 and 2 * Lmax + 1 <= sw, "extended labels must fit lane width"

    # Time tiling: second-to-minor block dim must be a multiple of 16 (bf16 sublanes).
    t_tile = int(min(max(16, -(-t_tile // 16) * 16), -(-T // 16) * 16))
    t_pad = pl.cdiv(T, t_tile) * t_tile
    if t_pad != T:
        hs_pad = jnp.pad(hs_pad, ((0, 0), (0, t_pad - T), (0, 0)))
    n_tt = t_pad // t_tile

    # Host-side precompute of blank-interleaved labels + skip-transition mask (B, SW).
    s = jnp.arange(sw, dtype=jnp.int32)[None, :]
    is_odd = (s % 2) == 1
    pos = (s - 1) // 2
    ys = ys_pad.astype(jnp.int32)
    lab = jnp.take_along_axis(ys, jnp.broadcast_to(jnp.clip(pos, 0, Lmax - 1), (B, sw)), axis=1)
    prev = jnp.take_along_axis(ys, jnp.broadcast_to(jnp.clip(pos - 1, 0, Lmax - 1), (B, sw)), axis=1)
    ext = jnp.where(is_odd, lab, 0).astype(jnp.int32)
    ext_prev = jnp.where(is_odd & (pos >= 1), prev, 0)
    skip = (is_odd & (s >= 2) & (ext != 0) & (ext != ext_prev)).astype(jnp.int32)

    hs_c = hs_pad.astype(matmul_dtype)
    w_c = w.astype(matmul_dtype)
    bias_c = bias.reshape(1, V).astype(jnp.float32)
    hlens_c = hlens.astype(jnp.int32)
    yslens_c = ys_lens.astype(jnp.int32)

    if _probe_roll_convention():
        shift1, shift2 = 1, 2                 # pltpu.roll matches np.roll
    else:
        shift1, shift2 = sw - 1, sw - 2       # opposite rotation direction

    kernel = functools.partial(_ctc_kernel, shift1=shift1, shift2=shift2)

    cost = pl.CostEstimate(
        flops=int(2 * B * (t_pad * D * V + t_pad * D * sw + D * V * sw)),
        transcendentals=int(B * t_pad * (V + 4 * sw)),
        bytes_accessed=int(hs_c.size * hs_c.dtype.itemsize
                           + w_c.size * w_c.dtype.itemsize
                           + (bias_c.size + ext.size + skip.size + 2 * B) * 4
                           + B * 8 * 128 * 4),
    )

    grid_spec = pltpu.PrefetchScalarGridSpec(
        num_scalar_prefetch=2,
        grid=(B, n_tt),
        in_specs=[
            pl.BlockSpec((1, t_tile, D), lambda bi, tt, hl, yl: (bi, tt, 0)),  # hs tile
            pl.BlockSpec((D, V), lambda bi, tt, hl, yl: (0, 0)),               # weight
            pl.BlockSpec((1, V), lambda bi, tt, hl, yl: (0, 0)),               # bias
            pl.BlockSpec((B, sw), lambda bi, tt, hl, yl: (0, 0)),              # ext labels
            pl.BlockSpec((B, sw), lambda bi, tt, hl, yl: (0, 0)),              # skip mask
        ],
        out_specs=pl.BlockSpec((1, 8, 128), lambda bi, tt, hl, yl: (bi, 0, 0)),
        scratch_shapes=[
            pltpu.VMEM((1, sw), jnp.float32),        # alpha, carried across time tiles
            pltpu.VMEM((t_tile, sw), jnp.float32),   # per-tile gathered log-probs
            pltpu.VMEM((D, sw), matmul_dtype),       # gathered projection columns
            pltpu.VMEM((1, sw), jnp.float32),        # gathered bias
        ],
    )

    out = pl.pallas_call(
        kernel,
        out_shape=jax.ShapeDtypeStruct((B, 8, 128), jnp.float32),
        grid_spec=grid_spec,
        compiler_params=pltpu.CompilerParams(
            dimension_semantics=("parallel", "arbitrary"),
            vmem_limit_bytes=32 * 1024 * 1024),
        cost_estimate=cost,
    )(hlens_c, yslens_c, hs_c, w_c, bias_c, ext, skip)

    # reduction='sum', then / ys_hat.size(1) == batch size after transpose(0, 1)
    loss = jnp.sum(out[:, 0, 0]) / jnp.float32(B)
    return loss, None


def _ctc_reference(hs, hlens, ys, ys_lens, w, bias):
    """Pure-numpy reference: Linear + log_softmax + CTCLoss(sum, zero_infinity)/B."""
    hs = hs.astype(np.float64)
    logits = hs @ w.astype(np.float64) + bias.astype(np.float64)
    m = logits.max(-1, keepdims=True)
    logp = logits - (m + np.log(np.exp(logits - m).sum(-1, keepdims=True)))
    B = hs.shape[0]
    total = 0.0
    for b in range(B):
        Tb, Lb = int(hlens[b]), int(ys_lens[b])
        ext = [0]
        for lab in ys[b, :Lb]:
            ext += [int(lab), 0]
        S = len(ext)
        alpha = np.full(S, -np.inf)
        alpha[0] = logp[b, 0, ext[0]]
        if S > 1:
            alpha[1] = logp[b, 0, ext[1]]
        for t in range(1, Tb):
            new = np.full(S, -np.inf)
            for s_i in range(S):
                val = alpha[s_i]
                if s_i >= 1:
                    val = np.logaddexp(val, alpha[s_i - 1])
                if s_i >= 2 and ext[s_i] != 0 and ext[s_i] != ext[s_i - 2]:
                    val = np.logaddexp(val, alpha[s_i - 2])
                new[s_i] = val + logp[b, t, ext[s_i]]
            alpha = new
        ll = alpha[S - 1] if S < 2 else np.logaddexp(alpha[S - 1], alpha[S - 2])
        loss = -ll
        if np.isinf(loss):
            loss = 0.0
        total += loss
    return total / B


if __name__ == "__main__":
    B, T, D, V, Lmax = 2, 32, 32, 16, 4   # odim=16, encoder_output_size=32
    key = jax.random.PRNGKey(0)
    k1, k2, k3, k4 = jax.random.split(key, 4)

    hs_pad = jax.random.normal(k1, (B, T, D), jnp.float32)
    # ctc_lo = nn.Linear(D, V): weight stored here already transposed -> (D, V)
    w = 0.1 * jax.random.normal(k2, (D, V), jnp.float32)
    bias = 0.1 * jax.random.normal(k3, (V,), jnp.float32)

    ys_pad = jax.random.randint(k4, (B, Lmax), 1, V)        # labels in [1, V-1]; 0 = blank
    hlens = jnp.array([T, T - 5], jnp.int32)                # second seq crosses a tile edge
    ys_lens = jnp.array([Lmax, Lmax - 1], jnp.int32)

    loss, loss_bias = ctc_forward(hs_pad, hlens, ys_pad, ys_lens, w, bias,
                                  sw=128, t_tile=16, matmul_dtype=jnp.bfloat16)
    loss = jax.block_until_ready(loss)

    ref = _ctc_reference(np.asarray(hs_pad), np.asarray(hlens), np.asarray(ys_pad),
                         np.asarray(ys_lens), np.asarray(w), np.asarray(bias))
    assert loss_bias is None
    # bf16 MXU operands -> slightly looser tolerance than pure f32.
    assert np.allclose(float(loss), ref, rtol=1.5e-2, atol=1.5e-2), (float(loss), ref)
    print("KERNEL_OK")
</pallas_src>

<mosaic_0001>
module attributes {stable_mosaic.version = 11 : i64} {
  func.func @probe_kernel(%arg0: memref<1x128xf32, #tpu.memory_space<vmem>>, %arg1: memref<1x128xf32, #tpu.memory_space<vmem>>) attributes {dimension_semantics = [], scalar_prefetch = 0 : i64, scratch_operands = 0 : i64, tpu.core_type = #tpu.core_type<tc>} {
    %c0 = arith.constant 0 : index
    %c0_0 = arith.constant 0 : index
    %0 = vector.load %arg0[%c0, %c0_0] : memref<1x128xf32, #tpu.memory_space<vmem>>, vector<1x128xf32>
    %c1_i32 = arith.constant 1 : i32
    %1 = tpu.dynamic_rotate %0 by %c1_i32 dim 1 : vector<1x128xf32>, i32 -> vector<1x128xf32>
    %c0_1 = arith.constant 0 : index
    %c0_2 = arith.constant 0 : index
    %2 = vector.load %arg1[%c0_1, %c0_2] : memref<1x128xf32, #tpu.memory_space<vmem>>, vector<1x128xf32>
    tpu.vector_store %arg1[%c0_1, %c0_2], %1 {strides = array<i32>} : memref<1x128xf32, #tpu.memory_space<vmem>>, vector<1x128xf32>,
    return
  }
}

</mosaic_0001>

<bundles_post_ra>
// kernel: tpu_custom_call.1
= control target key start
LH: loop header
LB: loop body
LE: loop exit
PB: predicated region body
PF: predicated region fallthrough
CT: control target
= control target key end

     0   :  { %6 = vsyncpa [#allocation3], 0  ;;  %s128_s0 = inlined_call_operand.hbm [shape: f32[1,128], index: 0, kind: input, shape index: {}]   ;;  %s129_s1 = inlined_call_operand.hbm [shape: f32[1,128], index: 1, kind: output, shape index: {}]  }
   0x1   :  { %7 = vsyncpa [#allocation4], 0  ;;  %s91_s6 = smov [#allocation2]   ;;  %s43_s10 = scalar_lea.hbm %s128_s0, 16 }
   0x2   :  { %s14_s7 = sshll.u32 %s91_s6, 4  ;;  %p44_p0 = scmp.ne.s32.totalorder %s128_s0, %s43_s10  ;;  %s15_s7 = int_to_ptr.vmem [resolvable:$true] %s14_s7 }
   0x3   :  { %p47_p1 = scmp.lt.u32.totalorder %s43_s10, %s128_s0 }
   0x5   :  { %p49_p2 = pnand %p47_p1, %p44_p0 }
   0x7   :  { %52 = shalt.err (!%p49_p2)
}
   0x8   :  { %s53_s15 = scalar_lea.vmem %s15_s7, 16  ;;  %s57_s16 = scalar_lea.vmem %s15_s7, 32 }
   0x9   :  { %p54_p3 = scmp.ne.s32.totalorder %s15_s7, %s53_s15  ;;  %p58_p4 = scmp.lt.s32.totalorder %s15_s7, %s15_s7 }
   0xa   :  { %p59_p5 = scmp.lt.s32.totalorder %s57_s16, %s53_s15 }
   0xc   :  { %p60_p6 = por %p59_p5, %p58_p4 }
   0xe   :  { %p61_p7 = pnand %p60_p6, %p54_p3 }
  0x10   :  { %64 = shalt.err (!%p61_p7)
}
  0x11   :  { %17 = dma.hbm_to_vmem [thread:$0]  %s128_s0, 16, %s15_s7, [#allocation3]  }
  0x12   :  { %87 = dma.done.wait [#allocation3], 16  }
  0x13   :  { %88 = vsyncadd [#allocation3], 4294967280  ;;  %v21_v0 = vld [vmem:[#allocation2] sm:$0x1]  ;;  %s92_s19 = smov 1   ;;  %s93_s20 = smov [#allocation5]  }
  0x14   :  { %22 = vrot.lane.b32.xlu0 %v21_v0, %s92_s19  ;;  %s31_s21 = sshll.u32 %s93_s20, 4  ;;  %s32_s21 = int_to_ptr.vmem [resolvable:$true] %s31_s21 }
  0x15   :  { %s65_s22 = scalar_lea.vmem %s32_s21, 16  ;;  %s69_s23 = scalar_lea.vmem %s32_s21, 32 }
  0x16   :  { %p66_p8 = scmp.ne.s32.totalorder %s32_s21, %s65_s22  ;;  %p70_p9 = scmp.lt.s32.totalorder %s32_s21, %s32_s21 }
  0x17   :  { %p71_p10 = scmp.lt.s32.totalorder %s69_s23, %s65_s22 }
  0x19   :  { %p72_p11 = por %p71_p10, %p70_p9 }
  0x1b   :  { %p73_p12 = pnand %p72_p11, %p66_p8 }
  0x86   :  { %v23_v1 = vpop.permute.xlu0 %22 }
  0x87   :  { %24 = vst [vmem:[#allocation5] sm:$0x1] %v23_v1 }
  0x88   :  { %76 = shalt.err (!%p73_p12)
}
  0x89   :  { %s77_s25 = scalar_lea.hbm %s129_s1, 16 }
  0x8a   :  { %p78_p13 = scmp.ne.s32.totalorder %s129_s1, %s77_s25  ;;  %p81_p0 = scmp.lt.u32.totalorder %s77_s25, %s129_s1 }
  0x8c   :  { %p83_p1 = pnand %p81_p0, %p78_p13 }
  0x8e   :  { %86 = shalt.err (!%p83_p1)
}
  0x8f   :  { %34 = dma.vmem_to_hbm [thread:$0]  %s32_s21, 16, %s129_s1, [#allocation4]  }
  0x90   :  { %89 = dma.done.wait [#allocation4], 16  }
  0x91   :  { %90 = vsyncadd [#allocation4], 4294967280 }
  0x92   :  { %38 = vsyncpa [#allocation3], 1 }
  0x93   :  { %39 = vsyncpa [#allocation4], 1 }

</bundles_post_ra>
